<compile_context>
chip_gen: v7x
topology: tpu7x:2x2x1
jax: 0.10.0
libtpu: 0.0.40
codegen_flags: <defaults>
</compile_context>

<pallas_src>
import numpy as np
import jax
import jax.numpy as jnp
from jax import lax
from jax.experimental import pallas as pl
from jax.experimental.pallas import tpu as pltpu

EPS = 1e-5
_INV_SQRT2 = 0.7071067811865476

# Column layout of the packed per-channel parameter block `pp` (shape (C, 16)):
_NTAP = 9        # cols 0..8 : 3x3 depthwise tap weights (col 4 unused, see _COL_LIN)
_COL_LIN = 9     # identity-BN scale + 1x1-DW scale + center 3x3 tap
_COL_DWB = 10    # fused DW-branch bias
_COL_B2 = 11     # FFN conv2 (projection) fused bias
_PP_W = 16


def _erf_poly(x):
    """erf via Abramowitz&Stegun 7.1.26 (|abs err| <= 1.5e-7).

    Uses only abs/mul/add/div/exp/select so it lowers on all TPU generations
    (exact lax.erf has no guaranteed Mosaic lowering)."""
    ax = jnp.abs(x)
    t = 1.0 / (1.0 + 0.3275911 * ax)
    poly = ((((1.061405429 * t - 1.453152027) * t + 1.421413741) * t
             - 0.284496736) * t + 0.254829592) * t
    y = 1.0 - poly * jnp.exp(-ax * ax)
    return jnp.where(x < 0, -y, y)


def _boundary_masks(H, W, HWp):
    """(9, HWp) f32 validity masks for the 9 taps of a 3x3 / pad=1 DW conv.

    Lane l < H*W maps to pixel (l // W, l % W); lanes l >= H*W are padding and
    get mask 0 for every tap."""
    HW = H * W
    l = np.arange(HW)
    hh, ww = l // W, l % W
    masks = np.zeros((9, HWp), np.float32)
    t = 0
    for oy in (-1, 0, 1):
        for ox in (-1, 0, 1):
            valid = ((hh + oy >= 0) & (hh + oy < H) &
                     (ww + ox >= 0) & (ww + ox < W))
            masks[t, :HW] = valid.astype(np.float32)
            t += 1
    return jnp.asarray(masks)


def repvit_block_pallas(x_nchw, params, mm_dtype=jnp.float32):
    """RepViTBlock (stride=1, in==out, se=False). x_nchw: (N, C, H, W) f32."""
    N, C, H, W = x_nchw.shape
    HW = H * W
    HWp = ((HW + 127) // 128) * 128          # lane-dense output stores
    C2 = params["w1"].shape[0]
    use_lowp = jnp.dtype(mm_dtype) != jnp.dtype(jnp.float32)

    x = x_nchw.reshape(N, C, HW)             # pure reshape of NCHW
    if HWp != HW:
        x = jnp.pad(x, ((0, 0), (0, 0), (0, HWp - HW)))   # zero lanes, masked off
    masks = _boundary_masks(H, W, HWp)

    w1 = params["w1"]
    w2 = params["w2"]
    if use_lowp:
        w1 = w1.astype(mm_dtype)
        w2 = w2.astype(mm_dtype)

    # 8 non-center taps: (mask row index, lane roll amount). The roll wraps
    # modulo HWp but every wrapped / out-of-image source is zeroed by its mask.
    taps = [(oy, ox) for oy in (-1, 0, 1) for ox in (-1, 0, 1)]
    tap_shifts = [(t, (-(oy * W + ox)) % HWp)
                  for t, (oy, ox) in enumerate(taps) if t != 4]

    def kernel(x_ref, m_ref, pp_ref, w1_ref, b1_ref, w2_ref, o_ref):
        xv = x_ref[0]                                         # (C, HWp) lane-dense

        # ---- token mixer (DW branch), whole image at once ----
        # identity-BN + 1x1 DW + center 3x3 tap are pre-folded into one affine
        # (lin, dw_b), so only the 8 rolled neighbour taps remain.
        acc = (xv * pp_ref[:, _COL_LIN:_COL_LIN + 1]
               + pp_ref[:, _COL_DWB:_COL_DWB + 1])
        for t, s in tap_shifts:
            shifted = pltpu.roll(xv, s, axis=1)               # XLU slot (free-ish)
            acc = acc + (shifted * m_ref[t:t + 1, :]) * pp_ref[:, t:t + 1]
        y = acc                                               # DW output / FFN input

        # ---- channel mixer (FFN): two matmuls over the full (C, HWp) image ----
        ym = y.astype(mm_dtype) if use_lowp else y
        h = jnp.dot(w1_ref[...], ym,
                    preferred_element_type=jnp.float32) + b1_ref[...]
        h = 0.5 * h * (1.0 + _erf_poly(h * _INV_SQRT2))       # exact GELU (torch default)
        hm = h.astype(mm_dtype) if use_lowp else h
        o = (jnp.dot(w2_ref[...], hm, preferred_element_type=jnp.float32)
             + pp_ref[:, _COL_B2:_COL_B2 + 1])
        o_ref[0] = (y + o).astype(o_ref.dtype)                # one lane-dense store

    # Rough per-step VMEM estimate; only raise the scoped limit if it is needed
    # (it never is for RepViT stages: C<=384, HW<=3136 stays in the low MiB).
    est_bytes = 4 * (2 * 2 * C * HWp                      # x + out, double-buffered
                     + 9 * HWp + C * _PP_W + C2 * (C + 1) + C * C2
                     + 3 * C * HWp + 2 * C2 * HWp)        # in-kernel temporaries
    cp_kwargs = dict(dimension_semantics=("parallel",))   # batch axis -> v7x megacore
    if est_bytes > 24 * 1024 * 1024:
        cp_kwargs["vmem_limit_bytes"] = min(2 * est_bytes, 64 * 1024 * 1024)

    out = pl.pallas_call(
        kernel,
        out_shape=jax.ShapeDtypeStruct((N, C, HWp), jnp.float32),
        grid_spec=pltpu.PrefetchScalarGridSpec(
            num_scalar_prefetch=0,
            grid=(N,),
            in_specs=[
                pl.BlockSpec((1, C, HWp), lambda n: (n, 0, 0)),   # image
                pl.BlockSpec((9, HWp), lambda n: (0, 0)),         # tap masks
                pl.BlockSpec((C, _PP_W), lambda n: (0, 0)),       # packed per-C params
                pl.BlockSpec((C2, C), lambda n: (0, 0)),          # FFN expand W
                pl.BlockSpec((C2, 1), lambda n: (0, 0)),          # FFN expand bias
                pl.BlockSpec((C, C2), lambda n: (0, 0)),          # FFN project W
            ],
            out_specs=pl.BlockSpec((1, C, HWp), lambda n: (n, 0, 0)),
        ),
        compiler_params=pltpu.CompilerParams(**cp_kwargs),
    )(x, masks, params["pp"], w1, params["b1"], w2)

    return out[:, :, :HW].reshape(N, C, H, W)


# ---------------- parameter setup (plain-JAX glue) ----------------
def _fuse_conv_bn(w_oihw, bn):
    gamma, beta, mean, var = bn
    s = gamma / jnp.sqrt(var + EPS)
    return w_oihw * s[:, None, None, None], beta - mean * s


def make_params(key, C):
    """Random conv weights + random eval-mode BN stats (nonzero gammas so the
    whole FFN path is exercised; forward math is identical for any BN stats)."""
    C2 = 2 * C
    ks = jax.random.split(key, 9)

    def bn(k, n):
        k1, k2, k3, k4 = jax.random.split(k, 4)
        return (1.0 + 0.2 * jax.random.normal(k1, (n,), jnp.float32),        # gamma
                0.2 * jax.random.normal(k2, (n,), jnp.float32),              # beta
                0.2 * jax.random.normal(k3, (n,), jnp.float32),              # running_mean
                0.5 + jax.nn.softplus(jax.random.normal(k4, (n,), jnp.float32)))  # var

    raw = dict(
        w_dw3=jax.random.normal(ks[0], (C, 1, 3, 3), jnp.float32) * 0.3,    # DW.conv1
        w_dw1=jax.random.normal(ks[1], (C, 1, 1, 1), jnp.float32) * 0.3,    # DW.conv2
        w_f1=jax.random.normal(ks[2], (C2, C, 1, 1), jnp.float32) * 0.2,    # FFN.conv1
        w_f2=jax.random.normal(ks[3], (C, C2, 1, 1), jnp.float32) * 0.2,    # FFN.conv2
        bn_dw3=bn(ks[4], C), bn_dw1=bn(ks[5], C), bn_id=bn(ks[6], C),
        bn_f1=bn(ks[7], C2), bn_f2=bn(ks[8], C),
    )

    # DW branch: fold the three BNs; 3x3 taps + per-channel affine
    fdw3, bdw3 = _fuse_conv_bn(raw["w_dw3"], raw["bn_dw3"])
    fdw1, bdw1 = _fuse_conv_bn(raw["w_dw1"], raw["bn_dw1"])
    g0, b0, m0, v0 = raw["bn_id"]
    s0 = g0 / jnp.sqrt(v0 + EPS)

    tap_w = fdw3[:, 0].reshape(C, 9)                     # row-major (ky, kx) taps
    lin = s0 + fdw1[:, 0, 0, 0] + tap_w[:, 4]            # identity + 1x1 DW + center tap
    dw_b = b0 - m0 * s0 + bdw3 + bdw1

    # FFN: 1x1 convs as channels-first matmuls (h = W1 @ y, o = W2 @ gelu(h))
    fW1, fB1 = _fuse_conv_bn(raw["w_f1"], raw["bn_f1"])
    fW2, fB2 = _fuse_conv_bn(raw["w_f2"], raw["bn_f2"])

    pp = jnp.zeros((C, _PP_W), jnp.float32)
    pp = pp.at[:, :_NTAP].set(tap_w)
    pp = pp.at[:, 4].set(0.0)                            # center tap folded into _COL_LIN
    pp = pp.at[:, _COL_LIN].set(lin)
    pp = pp.at[:, _COL_DWB].set(dw_b)
    pp = pp.at[:, _COL_B2].set(fB2)

    fused = dict(pp=pp, w1=fW1[:, :, 0, 0], b1=fB1.reshape(C2, 1), w2=fW2[:, :, 0, 0])
    return raw, fused


# ---------------- pure-JAX reference (NCHW, matches PyTorch eval fwd) ----------------
def ref_forward(x_nchw, raw):
    C = x_nchw.shape[1]
    hp = lax.Precision.HIGHEST   # keep the f32 reference exact on the MXU

    def conv_bn(x, w, bn, groups, pad):
        gamma, beta, mean, var = bn
        y = lax.conv_general_dilated(
            x, w, (1, 1), ((pad, pad), (pad, pad)),
            dimension_numbers=("NCHW", "OIHW", "NCHW"),
            feature_group_count=groups, precision=hp)
        s = gamma / jnp.sqrt(var + EPS)
        return y * s[None, :, None, None] + (beta - mean * s)[None, :, None, None]

    g0, b0, m0, v0 = raw["bn_id"]
    s0 = g0 / jnp.sqrt(v0 + EPS)
    bn_x = x_nchw * s0[None, :, None, None] + (b0 - m0 * s0)[None, :, None, None]
    y = (bn_x
         + conv_bn(x_nchw, raw["w_dw3"], raw["bn_dw3"], C, 1)
         + conv_bn(x_nchw, raw["w_dw1"], raw["bn_dw1"], C, 0))
    h = conv_bn(y, raw["w_f1"], raw["bn_f1"], 1, 0)
    h = 0.5 * h * (1.0 + lax.erf(h * _INV_SQRT2))        # exact erf GELU
    o = conv_bn(h, raw["w_f2"], raw["bn_f2"], 1, 0)
    return y + o


if __name__ == "__main__":
    key = jax.random.PRNGKey(0)
    kx, kp = jax.random.split(key)

    # RepViTBlock(C, 2C, C, kernel_size=3, stride=1, se=False) -> stride-1 branch
    N, C, H, W = 2, 8, 16, 16
    x = jax.random.normal(kx, (N, C, H, W), jnp.float32)
    raw, fused = make_params(kp, C)

    out = repvit_block_pallas(x, fused)      # f32 matmuls: keeps the 1e-3 check tight
    out = jax.block_until_ready(out)

    ref = ref_forward(x, raw)
    np.testing.assert_allclose(np.asarray(out), np.asarray(ref),
                               rtol=1e-3, atol=1e-3)
    print("KERNEL_OK")
</pallas_src>

<mosaic_0001>
module attributes {stable_mosaic.version = 11 : i64} {
  func.func @kernel(%arg0: i32, %arg1: memref<1x8x256xf32, #tpu.memory_space<vmem>>, %arg2: memref<9x256xf32, #tpu.memory_space<vmem>>, %arg3: memref<8x16xf32, #tpu.memory_space<vmem>>, %arg4: memref<16x8xf32, #tpu.memory_space<vmem>>, %arg5: memref<16x1xf32, #tpu.memory_space<vmem>>, %arg6: memref<8x16xf32, #tpu.memory_space<vmem>>, %arg7: memref<1x8x256xf32, #tpu.memory_space<vmem>>) attributes {dimension_semantics = [#tpu.dimension_semantics<parallel>], iteration_bounds = array<i64: 2>, scalar_prefetch = 0 : i64, scratch_operands = 0 : i64, tpu.core_type = #tpu.core_type<tc>, window_params = [{transform_indices = @transform_0, window_bounds = array<i64: 1, 8, 256>}, {pipeline_mode = #tpu.pipeline_mode<synchronous>, transform_indices = @transform_1, window_bounds = array<i64: 9, 256>}, {pipeline_mode = #tpu.pipeline_mode<synchronous>, transform_indices = @transform_2, window_bounds = array<i64: 8, 16>}, {pipeline_mode = #tpu.pipeline_mode<synchronous>, transform_indices = @transform_3, window_bounds = array<i64: 16, 8>}, {pipeline_mode = #tpu.pipeline_mode<synchronous>, transform_indices = @transform_4, window_bounds = array<i64: 16, 1>}, {pipeline_mode = #tpu.pipeline_mode<synchronous>, transform_indices = @transform_5, window_bounds = array<i64: 8, 16>}, {transform_indices = @transform_6, window_bounds = array<i64: 1, 8, 256>}]} {
    %c0 = arith.constant 0 : index
    %c0_0 = arith.constant 0 : index
    %c0_1 = arith.constant 0 : index
    %0 = vector.load %arg1[%c0, %c0_0, %c0_1] : memref<1x8x256xf32, #tpu.memory_space<vmem>>, vector<1x8x256xf32>
    %1 = vector.shape_cast %0 : vector<1x8x256xf32> to vector<8x256xf32>
    %c0_2 = arith.constant 0 : index
    %c9 = arith.constant 9 : index
    %2 = vector.load %arg3[%c0_2, %c9] : memref<8x16xf32, #tpu.memory_space<vmem>>, vector<8x1xf32>
    %3 = vector.broadcast %2 : vector<8x1xf32> to vector<8x256xf32>
    %4 = arith.mulf %1, %3 : vector<8x256xf32>
    %c0_3 = arith.constant 0 : index
    %c10 = arith.constant 10 : index
    %5 = vector.load %arg3[%c0_3, %c10] : memref<8x16xf32, #tpu.memory_space<vmem>>, vector<8x1xf32>
    %6 = vector.broadcast %5 : vector<8x1xf32> to vector<8x256xf32>
    %7 = arith.addf %4, %6 : vector<8x256xf32>
    %c17_i32 = arith.constant 17 : i32
    %8 = tpu.dynamic_rotate %1 by %c17_i32 dim 1 : vector<8x256xf32>, i32 -> vector<8x256xf32>
    %c0_4 = arith.constant 0 : index
    %c0_5 = arith.constant 0 : index
    %9 = vector.load %arg2[%c0_4, %c0_5] : memref<9x256xf32, #tpu.memory_space<vmem>>, vector<1x256xf32>
    %10 = vector.broadcast %9 : vector<1x256xf32> to vector<8x256xf32>
    %11 = arith.mulf %8, %10 : vector<8x256xf32>
    %c0_6 = arith.constant 0 : index
    %c0_7 = arith.constant 0 : index
    %12 = vector.load %arg3[%c0_6, %c0_7] : memref<8x16xf32, #tpu.memory_space<vmem>>, vector<8x1xf32>
    %13 = vector.broadcast %12 : vector<8x1xf32> to vector<8x256xf32>
    %14 = arith.mulf %11, %13 : vector<8x256xf32>
    %15 = arith.addf %7, %14 : vector<8x256xf32>
    %c16_i32 = arith.constant 16 : i32
    %16 = tpu.dynamic_rotate %1 by %c16_i32 dim 1 : vector<8x256xf32>, i32 -> vector<8x256xf32>
    %c1 = arith.constant 1 : index
    %c0_8 = arith.constant 0 : index
    %17 = vector.load %arg2[%c1, %c0_8] : memref<9x256xf32, #tpu.memory_space<vmem>>, vector<1x256xf32>
    %18 = vector.broadcast %17 : vector<1x256xf32> to vector<8x256xf32>
    %19 = arith.mulf %16, %18 : vector<8x256xf32>
    %c0_9 = arith.constant 0 : index
    %c1_10 = arith.constant 1 : index
    %20 = vector.load %arg3[%c0_9, %c1_10] : memref<8x16xf32, #tpu.memory_space<vmem>>, vector<8x1xf32>
    %21 = vector.broadcast %20 : vector<8x1xf32> to vector<8x256xf32>
    %22 = arith.mulf %19, %21 : vector<8x256xf32>
    %23 = arith.addf %15, %22 : vector<8x256xf32>
    %c15_i32 = arith.constant 15 : i32
    %24 = tpu.dynamic_rotate %1 by %c15_i32 dim 1 : vector<8x256xf32>, i32 -> vector<8x256xf32>
    %c2 = arith.constant 2 : index
    %c0_11 = arith.constant 0 : index
    %25 = vector.load %arg2[%c2, %c0_11] : memref<9x256xf32, #tpu.memory_space<vmem>>, vector<1x256xf32>
    %26 = vector.broadcast %25 : vector<1x256xf32> to vector<8x256xf32>
    %27 = arith.mulf %24, %26 : vector<8x256xf32>
    %c0_12 = arith.constant 0 : index
    %c2_13 = arith.constant 2 : index
    %28 = vector.load %arg3[%c0_12, %c2_13] : memref<8x16xf32, #tpu.memory_space<vmem>>, vector<8x1xf32>
    %29 = vector.broadcast %28 : vector<8x1xf32> to vector<8x256xf32>
    %30 = arith.mulf %27, %29 : vector<8x256xf32>
    %31 = arith.addf %23, %30 : vector<8x256xf32>
    %c1_i32 = arith.constant 1 : i32
    %32 = tpu.dynamic_rotate %1 by %c1_i32 dim 1 : vector<8x256xf32>, i32 -> vector<8x256xf32>
    %c3 = arith.constant 3 : index
    %c0_14 = arith.constant 0 : index
    %33 = vector.load %arg2[%c3, %c0_14] : memref<9x256xf32, #tpu.memory_space<vmem>>, vector<1x256xf32>
    %34 = vector.broadcast %33 : vector<1x256xf32> to vector<8x256xf32>
    %35 = arith.mulf %32, %34 : vector<8x256xf32>
    %c0_15 = arith.constant 0 : index
    %c3_16 = arith.constant 3 : index
    %36 = vector.load %arg3[%c0_15, %c3_16] : memref<8x16xf32, #tpu.memory_space<vmem>>, vector<8x1xf32>
    %37 = vector.broadcast %36 : vector<8x1xf32> to vector<8x256xf32>
    %38 = arith.mulf %35, %37 : vector<8x256xf32>
    %39 = arith.addf %31, %38 : vector<8x256xf32>
    %c255_i32 = arith.constant 255 : i32
    %40 = tpu.dynamic_rotate %1 by %c255_i32 dim 1 : vector<8x256xf32>, i32 -> vector<8x256xf32>
    %c5 = arith.constant 5 : index
    %c0_17 = arith.constant 0 : index
    %41 = vector.load %arg2[%c5, %c0_17] : memref<9x256xf32, #tpu.memory_space<vmem>>, vector<1x256xf32>
    %42 = vector.broadcast %41 : vector<1x256xf32> to vector<8x256xf32>
    %43 = arith.mulf %40, %42 : vector<8x256xf32>
    %c0_18 = arith.constant 0 : index
    %c5_19 = arith.constant 5 : index
    %44 = vector.load %arg3[%c0_18, %c5_19] : memref<8x16xf32, #tpu.memory_space<vmem>>, vector<8x1xf32>
    %45 = vector.broadcast %44 : vector<8x1xf32> to vector<8x256xf32>
    %46 = arith.mulf %43, %45 : vector<8x256xf32>
    %47 = arith.addf %39, %46 : vector<8x256xf32>
    %c241_i32 = arith.constant 241 : i32
    %48 = tpu.dynamic_rotate %1 by %c241_i32 dim 1 : vector<8x256xf32>, i32 -> vector<8x256xf32>
    %c6 = arith.constant 6 : index
    %c0_20 = arith.constant 0 : index
    %49 = vector.load %arg2[%c6, %c0_20] : memref<9x256xf32, #tpu.memory_space<vmem>>, vector<1x256xf32>
    %50 = vector.broadcast %49 : vector<1x256xf32> to vector<8x256xf32>
    %51 = arith.mulf %48, %50 : vector<8x256xf32>
    %c0_21 = arith.constant 0 : index
    %c6_22 = arith.constant 6 : index
    %52 = vector.load %arg3[%c0_21, %c6_22] : memref<8x16xf32, #tpu.memory_space<vmem>>, vector<8x1xf32>
    %53 = vector.broadcast %52 : vector<8x1xf32> to vector<8x256xf32>
    %54 = arith.mulf %51, %53 : vector<8x256xf32>
    %55 = arith.addf %47, %54 : vector<8x256xf32>
    %c240_i32 = arith.constant 240 : i32
    %56 = tpu.dynamic_rotate %1 by %c240_i32 dim 1 : vector<8x256xf32>, i32 -> vector<8x256xf32>
    %c7 = arith.constant 7 : index
    %c0_23 = arith.constant 0 : index
    %57 = vector.load %arg2[%c7, %c0_23] : memref<9x256xf32, #tpu.memory_space<vmem>>, vector<1x256xf32>
    %58 = vector.broadcast %57 : vector<1x256xf32> to vector<8x256xf32>
    %59 = arith.mulf %56, %58 : vector<8x256xf32>
    %c0_24 = arith.constant 0 : index
    %c7_25 = arith.constant 7 : index
    %60 = vector.load %arg3[%c0_24, %c7_25] : memref<8x16xf32, #tpu.memory_space<vmem>>, vector<8x1xf32>
    %61 = vector.broadcast %60 : vector<8x1xf32> to vector<8x256xf32>
    %62 = arith.mulf %59, %61 : vector<8x256xf32>
    %63 = arith.addf %55, %62 : vector<8x256xf32>
    %c239_i32 = arith.constant 239 : i32
    %64 = tpu.dynamic_rotate %1 by %c239_i32 dim 1 : vector<8x256xf32>, i32 -> vector<8x256xf32>
    %c8 = arith.constant 8 : index
    %c0_26 = arith.constant 0 : index
    %65 = vector.load %arg2[%c8, %c0_26] : memref<9x256xf32, #tpu.memory_space<vmem>>, vector<1x256xf32>
    %66 = vector.broadcast %65 : vector<1x256xf32> to vector<8x256xf32>
    %67 = arith.mulf %64, %66 : vector<8x256xf32>
    %c0_27 = arith.constant 0 : index
    %c8_28 = arith.constant 8 : index
    %68 = vector.load %arg3[%c0_27, %c8_28] : memref<8x16xf32, #tpu.memory_space<vmem>>, vector<8x1xf32>
    %69 = vector.broadcast %68 : vector<8x1xf32> to vector<8x256xf32>
    %70 = arith.mulf %67, %69 : vector<8x256xf32>
    %71 = arith.addf %63, %70 : vector<8x256xf32>
    %c0_29 = arith.constant 0 : index
    %c0_30 = arith.constant 0 : index
    %72 = vector.load %arg4[%c0_29, %c0_30] : memref<16x8xf32, #tpu.memory_space<vmem>>, vector<16x8xf32>
    %cst = arith.constant dense<0.000000e+00> : vector<16x256xf32>
    %73 = tpu.matmul %72, %71, %cst {dimension_numbers = #tpu.dot_dimension_numbers<[1], [0], [0], [1], [0, 0, 1, 1], [], []>} : vector<16x8xf32>, vector<8x256xf32>, vector<16x256xf32> -> vector<16x256xf32>
    %c0_31 = arith.constant 0 : index
    %c0_32 = arith.constant 0 : index
    %74 = vector.load %arg5[%c0_31, %c0_32] : memref<16x1xf32, #tpu.memory_space<vmem>>, vector<16x1xf32>
    %75 = vector.broadcast %74 : vector<16x1xf32> to vector<16x256xf32>
    %76 = arith.addf %73, %75 : vector<16x256xf32>
    %cst_33 = arith.constant 5.000000e-01 : f32
    %77 = vector.broadcast %cst_33 : f32 to vector<16x256xf32>
    %78 = arith.mulf %77, %76 : vector<16x256xf32>
    %cst_34 = arith.constant 0.707106769 : f32
    %79 = vector.broadcast %cst_34 : f32 to vector<16x256xf32>
    %80 = arith.mulf %76, %79 : vector<16x256xf32>
    %81 = math.absf %80 : vector<16x256xf32>
    %cst_35 = arith.constant 0.327591091 : f32
    %82 = vector.broadcast %cst_35 : f32 to vector<16x256xf32>
    %83 = arith.mulf %82, %81 : vector<16x256xf32>
    %cst_36 = arith.constant 1.000000e+00 : f32
    %84 = vector.broadcast %cst_36 : f32 to vector<16x256xf32>
    %85 = arith.addf %84, %83 : vector<16x256xf32>
    %cst_37 = arith.constant 1.000000e+00 : f32
    %86 = vector.broadcast %cst_37 : f32 to vector<16x256xf32>
    %87 = arith.divf %86, %85 : vector<16x256xf32>
    %cst_38 = arith.constant 1.06140542 : f32
    %88 = vector.broadcast %cst_38 : f32 to vector<16x256xf32>
    %89 = arith.mulf %88, %87 : vector<16x256xf32>
    %cst_39 = arith.constant 1.45315206 : f32
    %90 = vector.broadcast %cst_39 : f32 to vector<16x256xf32>
    %91 = arith.subf %89, %90 : vector<16x256xf32>
    %92 = arith.mulf %91, %87 : vector<16x256xf32>
    %cst_40 = arith.constant 1.42141378 : f32
    %93 = vector.broadcast %cst_40 : f32 to vector<16x256xf32>
    %94 = arith.addf %92, %93 : vector<16x256xf32>
    %95 = arith.mulf %94, %87 : vector<16x256xf32>
    %cst_41 = arith.constant 0.284496725 : f32
    %96 = vector.broadcast %cst_41 : f32 to vector<16x256xf32>
    %97 = arith.subf %95, %96 : vector<16x256xf32>
    %98 = arith.mulf %97, %87 : vector<16x256xf32>
    %cst_42 = arith.constant 0.254829586 : f32
    %99 = vector.broadcast %cst_42 : f32 to vector<16x256xf32>
    %100 = arith.addf %98, %99 : vector<16x256xf32>
    %101 = arith.mulf %100, %87 : vector<16x256xf32>
    %cst_43 = arith.constant 0.000000e+00 : f32
    %102 = vector.broadcast %cst_43 : f32 to vector<16x256xf32>
    %103 = arith.subf %102, %81 : vector<16x256xf32>
    %104 = arith.mulf %103, %81 : vector<16x256xf32>
    %105 = math.exp %104 : vector<16x256xf32>
    %106 = arith.mulf %101, %105 : vector<16x256xf32>
    %cst_44 = arith.constant 1.000000e+00 : f32
    %107 = vector.broadcast %cst_44 : f32 to vector<16x256xf32>
    %108 = arith.subf %107, %106 : vector<16x256xf32>
    %cst_45 = arith.constant 0.000000e+00 : f32
    %109 = vector.broadcast %cst_45 : f32 to vector<16x256xf32>
    %110 = arith.cmpf olt, %80, %109 : vector<16x256xf32>
    %cst_46 = arith.constant 0.000000e+00 : f32
    %111 = vector.broadcast %cst_46 : f32 to vector<16x256xf32>
    %112 = arith.subf %111, %108 : vector<16x256xf32>
    %113 = arith.select %110, %112, %108 : vector<16x256xi1>, vector<16x256xf32>
    %cst_47 = arith.constant 1.000000e+00 : f32
    %114 = vector.broadcast %cst_47 : f32 to vector<16x256xf32>
    %115 = arith.addf %114, %113 : vector<16x256xf32>
    %116 = arith.mulf %78, %115 : vector<16x256xf32>
    %c0_48 = arith.constant 0 : index
    %c0_49 = arith.constant 0 : index
    %117 = vector.load %arg6[%c0_48, %c0_49] : memref<8x16xf32, #tpu.memory_space<vmem>>, vector<8x16xf32>
    %cst_50 = arith.constant dense<0.000000e+00> : vector<8x256xf32>
    %118 = tpu.matmul %117, %116, %cst_50 {dimension_numbers = #tpu.dot_dimension_numbers<[1], [0], [0], [1], [0, 0, 1, 1], [], []>} : vector<8x16xf32>, vector<16x256xf32>, vector<8x256xf32> -> vector<8x256xf32>
    %c0_51 = arith.constant 0 : index
    %c11 = arith.constant 11 : index
    %119 = vector.load %arg3[%c0_51, %c11] : memref<8x16xf32, #tpu.memory_space<vmem>>, vector<8x1xf32>
    %120 = vector.broadcast %119 : vector<8x1xf32> to vector<8x256xf32>
    %121 = arith.addf %118, %120 : vector<8x256xf32>
    %122 = arith.addf %71, %121 : vector<8x256xf32>
    %c0_52 = arith.constant 0 : index
    %c0_53 = arith.constant 0 : index
    %c0_54 = arith.constant 0 : index
    %123 = vector.load %arg7[%c0_52, %c0_53, %c0_54] : memref<1x8x256xf32, #tpu.memory_space<vmem>>, vector<1x8x256xf32>
    %124 = vector.shape_cast %123 : vector<1x8x256xf32> to vector<8x256xf32>
    %125 = vector.shape_cast %122 : vector<8x256xf32> to vector<1x8x256xf32>
    tpu.vector_store %arg7[%c0_52, %c0_53, %c0_54], %125 {strides = array<i32>} : memref<1x8x256xf32, #tpu.memory_space<vmem>>, vector<1x8x256xf32>,
    return
  }
  func.func @transform_0(%arg0: i32) -> (i32, i32, i32) {
    %c0_i32 = arith.constant 0 : i32
    %c0_i32_0 = arith.constant 0 : i32
    %c0_i32_1 = arith.constant 0 : i32
    return %arg0, %c0_i32, %c0_i32_0 : i32, i32, i32
  }
  func.func @transform_1(%arg0: i32) -> (i32, i32) {
    %c0_i32 = arith.constant 0 : i32
    %c0_i32_0 = arith.constant 0 : i32
    %c0_i32_1 = arith.constant 0 : i32
    return %c0_i32, %c0_i32_0 : i32, i32
  }
  func.func @transform_2(%arg0: i32) -> (i32, i32) {
    %c0_i32 = arith.constant 0 : i32
    %c0_i32_0 = arith.constant 0 : i32
    %c0_i32_1 = arith.constant 0 : i32
    return %c0_i32, %c0_i32_0 : i32, i32
  }
  func.func @transform_3(%arg0: i32) -> (i32, i32) {
    %c0_i32 = arith.constant 0 : i32
    %c0_i32_0 = arith.constant 0 : i32
    %c0_i32_1 = arith.constant 0 : i32
    return %c0_i32, %c0_i32_0 : i32, i32
  }
  func.func @transform_4(%arg0: i32) -> (i32, i32) {
    %c0_i32 = arith.constant 0 : i32
    %c0_i32_0 = arith.constant 0 : i32
    %c0_i32_1 = arith.constant 0 : i32
    return %c0_i32, %c0_i32_0 : i32, i32
  }
  func.func @transform_5(%arg0: i32) -> (i32, i32) {
    %c0_i32 = arith.constant 0 : i32
    %c0_i32_0 = arith.constant 0 : i32
    %c0_i32_1 = arith.constant 0 : i32
    return %c0_i32, %c0_i32_0 : i32, i32
  }
  func.func @transform_6(%arg0: i32) -> (i32, i32, i32) {
    %c0_i32 = arith.constant 0 : i32
    %c0_i32_0 = arith.constant 0 : i32
    %c0_i32_1 = arith.constant 0 : i32
    return %arg0, %c0_i32, %c0_i32_0 : i32, i32, i32
  }
}

</mosaic_0001>

<bundles_post_ra>
// kernel: tpu_custom_call.1
= control target key start
LH: loop header
LB: loop body
LE: loop exit
PB: predicated region body
PF: predicated region fallthrough
CT: control target
= control target key end

     0   :  { %11 = vsyncpa [#allocation3], 0  ;;  %s1483_s0 = inlined_call_operand.vmem [shape: f32[2,8,256], index: 0, kind: input, shape index: {}]   ;;  %s1484_s1 = inlined_call_operand.hbm [shape: f32[9,256], index: 1, kind: input, shape index: {}]   ;;  %s1485_s2 = inlined_call_operand.vmem [shape: f32[8,16], index: 2, kind: input, shape index: {}]   ;;  %s1486_s3 = inlined_call_operand.vmem [shape: f32[16,8], index: 3, kind: input, shape index: {}]   ;;  %s1487_s4 = inlined_call_operand.vmem [shape: f32[16,1], index: 4, kind: input, shape index: {}]   ;;  %s1488_s5 = inlined_call_operand.vmem [shape: f32[8,16], index: 5, kind: input, shape index: {}]   ;;  %s1489_s6 = inlined_call_operand.hbm [shape: f32[2,8,256], index: 6, kind: output, shape index: {}]  }
   0x1   :  { %12 = vsyncpa [#allocation4], 0 }
   0x2   :  { %14 = vsyncpa [#allocation4 + $0x1], 0  ;;  %s1186_s21 = smov 0   ;;  %s1188_s22 = smov 0  }
   0x3   :  { %s1190_s23 = smov 0   ;;  %s1192_s24 = smov 0  }
   0x4 LB: > { %s1207_s25 = sadd.s32 4294967295, %s1125_s24   ;;  %s898_s26 = sadd.s32 4294967294, %s1125_s24   ;;  %s1125_s24 = sphi %s1192_s24, %s1505_s24   ;;  %s1121_s23 = sphi %s1190_s23, %s1504_s23   ;;  %s1117_s22 = sphi %s1188_s22, %s1503_s22   ;;  %s1113_s21 = sphi %s1186_s21, %s1502_s21  }
   0x5   : > { %s1211_s27 = sadd.s32 1, %s1125_s24   ;;  %s158_s28 = sadd.s32 1, %s1121_s23 }
   0x6   : > { %s155_s29 = ssub.s32 %s1125_s24, %s1211_s27  ;;  %p168_p0 = scmp.ne.s32.totalorder %s1121_s23, %s1117_s22 }
   0x7   : > { %p156_p1 = scmp.eq.s32.totalorder %s155_s29, 0  ;;  %p169_p2 = scmp.eq.s32.totalorder %s1207_s25, 1 }
   0x8   : > { %p174_p3 = scmp.ne.s32.totalorder %s1117_s22, %s1113_s21  ;;  %p175_p4 = scmp.eq.s32.totalorder %s898_s26, 1 }
   0x9   : > { %s1222_s30 = scalar_select %p156_p1, %s1121_s23, %s158_s28  }
   0xa   : > { %p1224_p5 = por %p169_p2, %p168_p0  ;;  %p1228_p6 = por %p175_p4, %p174_p3 }
   0xb   : > { %p899_p7 = scmp.ge.s32.totalorder %s1125_s24, 1  ;;  %p182_p8 = scmp.lt.s32.totalorder %s1125_s24, 3 }
   0xc   : > { %s1493_s7 = scalar_select %p1224_p5, 1, 0 }
   0xd   : > { %s1494_s8 = scalar_select %p1228_p6, 1, 0 }
   0xe   : > { %p1490_p9 = scmp.eq.s32.totalorder %s1207_s25, 0  ;;  %p1235_p10 = pnand %p899_p7, %p182_p8 }
   0xf   : > { %s1127_s10 = smov [#allocation2]   ;;  %s1031_s15 = scalar_lea.hbm %s1484_s1, 512 }
  0x10   : > { %s1495_s9 = scalar_select %p1235_p10, 1, 0 }
  0x11   : > { %s194_s11 = sshll.u32 %s1127_s10, 4  ;;  %p935_p11 = pneg %p1235_p10  ;;  %s195_s11 = int_to_ptr.vmem [resolvable:$true] %s194_s11 }
  0x12   : > { %p1032_p13 = scmp.ne.s32.totalorder %s1484_s1, %s1031_s15  ;;  %p1038_p3 = scmp.lt.u32.totalorder %s1031_s15, %s1484_s1 }
  0x13   : > { %p1243_p12 = pnand %p1490_p9, %p935_p11 }
  0x15   : > { %p1033_p0 = pneg %p1243_p12 }
  0x17   : > { %p1034_p1 = pnand %p1033_p0, %p1032_p13 }
  0x19   : > { %p1035_p2 = pneg %p1034_p1 }
  0x1b   : > { %p1040_p4 = pnand %p1038_p3, %p1035_p2 }
  0x1d   : > { %1043 = shalt.err (!%p1040_p4)
}
  0x1e   : > { %s1044_s20 = scalar_lea.vmem %s195_s11, 512  ;;  %p1052_p9 = scmp.lt.s32.totalorder %s195_s11, %s195_s11 }
  0x1f   : > { %p1045_p7 = scmp.ne.s32.totalorder %s195_s11, %s1044_s20  ;;  %p1053_p6 = scmp.lt.s32.totalorder %s1044_s20, %s1044_s20 }
  0x21   : > { %p1047_p8 = pnand %p1045_p7, %p1033_p0  ;;  %p1054_p5 = por %p1053_p6, %p1052_p9 }
  0x23   : > { %p1048_p11 = pneg %p1047_p8 }
  0x25   : > { %p1055_p10 = pnand %p1054_p5, %p1048_p11 }
  0x27   : > { %1058 = shalt.err (!%p1055_p10)
}
  0x28   : > { %s1128_s26 = smov 256   ;;  %s1129_s28 = smov 16  }
  0x29   : > { %938 = dma.hbm_to_vmem [thread:$0]  (!%p1243_p12), %s1484_s1, 512, %s195_s11, [#allocation3], %s1128_s26, %s1128_s26, %s1129_s28  }
  0x2a   : > { %p1497_p13 = scmp.ne.s32.totalorder %s1495_s9, 0 }
  0x2b   : > { %p1498_p1 = scmp.eq.s32.totalorder (!%p1497_p13), %s1207_s25, 0 }
  0x2c   : > { %230 = sbr.rel (%p1497_p13) target bundleno = 756 (0x2f4), region = 44 }
  0x33   : > { %1104 = dma.done.wait (%p1498_p1), [#allocation3], 512   ;;  %p1499_p0 = pmov %p1498_p1 }
  0x34   : > { %v1130_v0 = vmov 0   ;;  %v1131_v1 = vmov 9   ;;  %p260_p5 = scmp.lt.s32.totalorder %s1207_s25, 1  ;;  %v1274_v2 = vld [vmem:[%s1485_s2] sm:$0xff]  ;;  %v1132_v3 = vmov 1   ;;  %v1133_v4 = vmov 10  }
  0x35   : > { %1106 = vsyncadd (%p1499_p0), [#allocation3], 4294966784  ;;  %1003 = vset.pattern.permute.xlu1 %v1130_v0  ;;  %1001 = vset.pattern.permute.xlu0 %v1131_v1  ;;  %s1134_s17 = smov 17   ;;  %v1135_v7 = vmov 2   ;;  %v1136_v8 = vmov 3   ;;  %s1137_s18 = smov 16   ;;  %v285_v26 = vlaneseq }
  0x36   : > { %s261_s12 = scalar_select %p260_p5, %s1207_s25, 1  ;;  %305 = vperm.xlu1 %1003, %v1274_v2   ;;  %270 = vperm.xlu0 %1001, %v1274_v2   ;;  %v1139_v9 = vmov 5   ;;  %v1140_v10 = vmov 6   ;;  %v1142_v11 = vmov 7   ;;  %v1143_v12 = vmov 8   ;;  %v524_v14 = vld [vmem:[%s1487_s4] sm:$0xff] }
  0x37   : > { %s1138_s19 = smov 15   ;;  %s1141_s20 = smov 1   ;;  %v1148_v13 = vmov 0.0   ;;  %v525_v15 = vld [vmem:[%s1487_s4 + $0x8] sm:$0xff]  ;;  %v293_v29 = vshrl.u32 %v285_v26, 7  ;;  %v1323_v31 = vand.u32 127, %v285_v26 }
  0x38   : > { %s923_s9 = sshll.u32 %s261_s12, 4  ;;  %s1144_s26 = smov 127   ;;  %607 = vmatprep.mubr.f32.mxu0 %v1148_v13  ;;  %801 = vmatprep.mubr.f32.mxu1 %v1148_v13  ;;  %v290_v36 = vld [vmem:[#allocation2] ss:$8 sm:$0x3]  ;;  %vm536_vm8 = vcmask 64512  }
  0x39   : > { %s264_s16 = scalar_lea.vmem %s1483_s0, %s923_s9  ;;  %s1145_s28 = smov 111   ;;  %v1325_v33 = vsub.s32 0, %v293_v29  ;;  %v1327_v34 = vsub.s32 1, %v293_v29  ;;  %vm287_vm0 = vcmp.lt.s32.totalorder %v1323_v31, 17  ;;  %vm316_vm1 = vcmp.lt.s32.totalorder %v1323_v31, 16 }
  0x3a   : > { %1004 = vset.pattern.permute.xlu1 %v1132_v3  ;;  %1002 = vset.pattern.permute.xlu0 %v1133_v4  ;;  %v1283_v5 = vld [vmem:[%s264_s16] sm:$0xff]  ;;  %v1285_v6 = vld [vmem:[%s264_s16 + $0x8] sm:$0xff]  ;;  %s1146_s29 = smov 113   ;;  %s1147_s10 = smov 112   ;;  %vm346_vm2 = vcmp.lt.s32.totalorder %v1323_v31, 15  ;;  %vm376_vm3 = vcmp.lt.s32.totalorder %v1323_v31, 1 }
  0x3b   : > { %335 = vperm.xlu1 %1004, %v1274_v2   ;;  %276 = vperm.xlu0 %1002, %v1274_v2   ;;  %v320_v38 = vld [vmem:[#allocation2 + $0x1] ss:$8 sm:$0x3]  ;;  %v295_v39 = vrot.slane %v290_v36, %v1325_v33  ;;  %v299_v40 = vrot.slane %v290_v36, %v1327_v34  ;;  %v350_v45 = vld [vmem:[#allocation2 + $0x2] ss:$8 sm:$0x3] }
  0x3c   : > { %v325_v43 = vrot.slane %v320_v38, %v1325_v33  ;;  %v329_v44 = vrot.slane %v320_v38, %v1327_v34  ;;  %v380_v46 = vld [vmem:[#allocation2 + $0x3] ss:$8 sm:$0x3]  ;;  %v355_v55 = vrot.slane %v350_v45, %v1325_v33  ;;  %v359_v56 = vrot.slane %v350_v45, %v1327_v34  ;;  %v410_v62 = vld [vmem:[#allocation2 + $0x5] ss:$8 sm:$0x3] }
  0x3d   : > { %v385_v57 = vrot.slane %v380_v46, %v1325_v33  ;;  %v389_v3 = vrot.slane %v380_v46, %v1327_v34  ;;  %vm406_vm4 = vcmp.lt.s32.totalorder %v1323_v31, 127  ;;  %vm436_vm5 = vcmp.lt.s32.totalorder %v1323_v31, 113  ;;  %v470_v36 = vld [vmem:[#allocation2 + $0x7] ss:$8 sm:$0x3]  ;;  %p1500_p9 = scmp.ne.s32.totalorder %s1493_s7, 0 }
  0x3e   : > { %vm466_vm6 = vcmp.lt.s32.totalorder %v1323_v31, 112  ;;  %v500_v45 = vld [vmem:[#allocation2 + $0x10] ss:$8 sm:$0x3]  ;;  %vm496_vm7 = vcmp.lt.s32.totalorder %v1323_v31, 111  ;;  %v523_v31 = vld [vmem:[%s1486_s3 + $0x8] sm:$0xff] }
  0x3f   : > { %281 = vrot.lane.b32.xlu1 %v1283_v5, %s1134_s17  ;;  %283 = vrot.lane.b32.xlu0 %v1285_v6, %s1134_s17  ;;  %vm733_vm13 = vcmask 130048   ;;  %s1150_s11 = smov [#allocation5]  }
  0x40   : > { %1005 = vset.pattern.permute.xlu1 %v1135_v7  ;;  %1006 = vset.pattern.permute.xlu0 %v1136_v8  ;;  %s1063_s15 = sshll.u32 %s1150_s11, 4  ;;  %s1064_s15 = int_to_ptr.vmem [resolvable:$false] %s1063_s15 }
  0x41   : > { %s1065_s16 = scalar_lea.vmem %s1064_s15, 512 }
  0x43   : > { %365 = vperm.xlu1 %1005, %v1274_v2   ;;  %312 = vrot.lane.b32.xlu0 %v1283_v5, %s1137_s18 }
  0x47   : > { %314 = vrot.lane.b32.xlu1 %v1285_v6, %s1137_s18  ;;  %395 = vperm.xlu0 %1006, %v1274_v2  }
  0x48   : > { %1012 = vset.pattern.permute.xlu1 %v1130_v0 }
  0x4b   : > { %342 = vrot.lane.b32.xlu1 %v1283_v5, %s1138_s19  ;;  %1007 = vset.pattern.permute.xlu0 %v1139_v9 }
  0x4c   : > { %425 = vperm.xlu0 %1007, %v1274_v2  }
  0x4f   : > { %344 = vrot.lane.b32.xlu1 %v1285_v6, %s1138_s19 }
  0x50   : > { %1008 = vset.pattern.permute.xlu0 %v1140_v10 }
  0x51   : > { %455 = vperm.xlu0 %1008, %v1274_v2  }
  0x53   : > { %372 = vrot.lane.b32.xlu1 %v1283_v5, %s1141_s20 }
  0x55   : > { %1009 = vset.pattern.permute.xlu0 %v1142_v11  ;;  %v415_v11 = vrot.slane %v410_v62, %v1325_v33 }
  0x56   : > { %485 = vperm.xlu0 %1009, %v1274_v2  }
  0x57   : > { %374 = vrot.lane.b32.xlu1 %v1285_v6, %s1141_s20  ;;  %s257_s20 = sand.u32 1, %s1117_s22  }
  0x5a   : > { %1010 = vset.pattern.permute.xlu0 %v1143_v12  ;;  %v440_v12 = vld [vmem:[#allocation2 + $0x6] ss:$8 sm:$0x3] }
  0x5b   : > { %402 = vrot.lane.b32.xlu1 %v1283_v5, %s1144_s26  ;;  %515 = vperm.xlu0 %1010, %v1274_v2   ;;  %v445_v26 = vrot.slane %v440_v12, %v1325_v33 }
  0x5f   : > { %404 = vrot.lane.b32.xlu1 %v1285_v6, %s1144_s26  ;;  %492 = vrot.lane.b32.xlu0 %v1283_v5, %s1145_s28  ;;  %s904_s26 = sshll.u32 %s257_s20, 4 }
  0x60   : > { %1011 = vset.pattern.permute.xlu0 %v1130_v0 }
  0x63   : > { %432 = vrot.lane.b32.xlu1 %v1283_v5, %s1146_s29  ;;  %528 = vperm.xlu0 %1011, %v524_v14  }
  0x67   : > { %434 = vrot.lane.b32.xlu1 %v1285_v6, %s1146_s29  ;;  %s259_s29 = scalar_lea.vmem [#allocation5], %s904_s26 }
  0x6b   : > { %462 = vrot.lane.b32.xlu1 %v1283_v5, %s1147_s10 }
  0x6f   : > { %464 = vrot.lane.b32.xlu1 %v1285_v6, %s1147_s10  ;;  %s827_s10 = sshll.u32 %s259_s29, 4  ;;  %s1443_s10 = int_to_ptr.vmem [resolvable:$true] %s827_s10 }
  0x70   : > { %s1059_s9 = scalar_lea.vmem %s1443_s10, 256  ;;  %p1066_p2 = scmp.lt.s32.totalorder %s1443_s10, %s1064_s15 }
  0x71   : > { %p1060_p6 = scmp.ne.s32.totalorder %s1443_s10, %s1059_s9  ;;  %p1067_p3 = scmp.lt.s32.totalorder %s1065_s16, %s1059_s9 }
  0x73   : > { %494 = vrot.lane.b32.xlu1 %v1285_v6, %s1145_s28  ;;  %s924_s28 = sshll.u32 %s1207_s25, 8  ;;  %s813_s25 = scalar_lea.sflag [#allocation4], %s257_s20 }
  0x74   : > { %s1441_s14 = scalar_lea.hbm %s1489_s6, %s924_s28  ;;  %p1061_p10 = pnand %p1060_p6, %p1500_p9 }
  0x75   : > { %p1068_p4 = por %p1067_p3, %p1066_p2 }
  0x76   : > { %p1062_p12 = pneg %p1061_p10 }
  0x77   : > { %533 = vperm.xlu1 %1012, %v525_v15  }
  0x78   : > { %p1069_p7 = pnand %p1068_p4, %p1062_p12 }
  0xb5   : > { %v306_v16 = vpop.permute.xlu1 %305  ;;  %v271_v19 = vpop.permute.xlu0 %270 }
  0xb6   : > { %v273_v49 = vmul.f32 %v271_v19, %v1283_v5  ;;  %v274_v50 = vmul.f32 %v271_v19, %v1285_v6 }
  0xba   : > { %v1317_v17 = vpop.permute.xlu1 %335  ;;  %v277_v21 = vpop.permute.xlu0 %276 }
  0xbb   : > { %v279_v0 = vadd.f32 %v277_v21, %v273_v49  ;;  %v280_v1 = vadd.f32 %v277_v21, %v274_v50  ;;  %v479_v49 = vrot.slane %v470_v36, %v1327_v34 }
  0xbe   : > { %v282_v18 = vpop.permute.xlu1 %281  ;;  %v284_v24 = vpop.permute.xlu0 %283 }
  0xbf   : > { %v288_v41 = vsel %vm287_vm0, %v282_v18, %v284_v24  ;;  %v289_v42 = vsel %vm287_vm0, %v284_v24, %v282_v18  ;;  %v419_v18 = vrot.slane %v410_v62, %v1327_v34 }
  0xc0   : > { %v302_v53 = vmul.f32 %v295_v39, %v289_v42  ;;  %v303_v54 = vmul.f32 %v299_v40, %v288_v41 }
  0xc2   : > { %v1319_v20 = vpop.permute.xlu1 %365  ;;  %v313_v27 = vpop.permute.xlu0 %312  ;;  %v308_v4 = vmul.f32 %v306_v16, %v302_v53  ;;  %v309_v5 = vmul.f32 %v306_v16, %v303_v54 }
  0xc4   : > { %v310_v24 = vadd.f32 %v308_v4, %v279_v0 }
  0xc6   : > { %v315_v22 = vpop.permute.xlu1 %314  ;;  %v1321_v30 = vpop.permute.xlu0 %395 }
  0xc7   : > { %v317_v51 = vsel %vm316_vm1, %v313_v27, %v315_v22  ;;  %v318_v52 = vsel %vm316_vm1, %v315_v22, %v313_v27  ;;  %v449_v27 = vrot.slane %v440_v12, %v1327_v34 }
  0xc8   : > { %v332_v58 = vmul.f32 %v325_v43, %v318_v52  ;;  %v333_v59 = vmul.f32 %v329_v44, %v317_v51 }
  0xca   : > { %v343_v23 = vpop.permute.xlu1 %342  ;;  %v338_v14 = vmul.f32 %v1317_v17, %v332_v58  ;;  %v339_v15 = vmul.f32 %v1317_v17, %v333_v59 }
  0xcb   : > { %v1329_v35 = vpop.permute.xlu0 %425 }
  0xce   : > { %v345_v25 = vpop.permute.xlu1 %344 }
  0xcf   : > { %v347_v60 = vsel %vm346_vm2, %v343_v23, %v345_v25  ;;  %v348_v61 = vsel %vm346_vm2, %v345_v25, %v343_v23  ;;  %v311_v25 = vadd.f32 %v309_v5, %v280_v1 }
  0xd0   : > { %v1338_v48 = vpop.permute.xlu0 %455  ;;  %v362_v9 = vmul.f32 %v355_v55, %v348_v61  ;;  %v363_v10 = vmul.f32 %v359_v56, %v347_v60  ;;  %v505_v55 = vrot.slane %v500_v45, %v1325_v33 }
  0xd1   : > { %v341_v42 = vadd.f32 %v339_v15, %v311_v25 }
  0xd2   : > { %v373_v28 = vpop.permute.xlu1 %372  ;;  %v368_v17 = vmul.f32 %v1319_v20, %v362_v9 }
  0xd5   : > { %v486_v8 = vpop.permute.xlu0 %485 }
  0xd6   : > { %v375_v32 = vpop.permute.xlu1 %374 }
  0xd7   : > { %v377_v6 = vsel %vm376_vm3, %v373_v28, %v375_v32  ;;  %v378_v7 = vsel %vm376_vm3, %v375_v32, %v373_v28  ;;  %v369_v28 = vmul.f32 %v1319_v20, %v363_v10  ;;  %v475_v20 = vrot.slane %v470_v36, %v1325_v33 }
  0xd8   : > { %v392_v21 = vmul.f32 %v385_v57, %v378_v7  ;;  %v393_v22 = vmul.f32 %v389_v3, %v377_v6 }
  0xd9   : > { %v371_v51 = vadd.f32 %v369_v28, %v341_v42 }
  0xda   : > { %v403_v37 = vpop.permute.xlu1 %402  ;;  %v516_v41 = vpop.permute.xlu0 %515  ;;  %v398_v43 = vmul.f32 %v1321_v30, %v392_v21  ;;  %v399_v44 = vmul.f32 %v1321_v30, %v393_v22  ;;  %v509_v30 = vrot.slane %v500_v45, %v1327_v34 }
  0xdc   : > { %v401_v57 = vadd.f32 %v399_v44, %v371_v51 }
  0xde   : > { %v405_v47 = vpop.permute.xlu1 %404 }
  0xdf   : > { %v407_v16 = vsel %vm406_vm4, %v403_v37, %v405_v47  ;;  %v408_v23 = vsel %vm406_vm4, %v405_v47, %v403_v37  ;;  %v340_v37 = vadd.f32 %v338_v14, %v310_v24 }
  0xe0   : > { %v422_v38 = vmul.f32 %v415_v11, %v407_v16  ;;  %v423_v39 = vmul.f32 %v419_v18, %v408_v23 }
  0xe1   : > { %v370_v50 = vadd.f32 %v368_v17, %v340_v37 }
  0xe2   : > { %v433_v63 = vpop.permute.xlu1 %432  ;;  %v428_v52 = vmul.f32 %v1329_v35, %v422_v38  ;;  %v429_v53 = vmul.f32 %v1329_v35, %v423_v39  ;;  %v493_v35 = vpop.permute.xlu0 %492 }
  0xe3   : > { %v400_v56 = vadd.f32 %v398_v43, %v370_v50 }
  0xe4   : > { %v431_v1 = vadd.f32 %v429_v53, %v401_v57 }
  0xe5   : > { %v430_v0 = vadd.f32 %v428_v52, %v400_v56 }
  0xe6   : > { %v435_v19 = vpop.permute.xlu1 %434  ;;  %v529_v21 = vpop.permute.xlu0 %528 }
  0xe7   : > { %v437_v29 = vsel %vm436_vm5, %v433_v63, %v435_v19  ;;  %v438_v32 = vsel %vm436_vm5, %v435_v19, %v433_v63  ;;  %v1149_v19 = vmov 11  }
  0xe8   : > { %v452_v46 = vmul.f32 %v445_v26, %v437_v29  ;;  %v453_v47 = vmul.f32 %v449_v27, %v438_v32  ;;  %1013 = vset.pattern.permute.xlu1 %v1149_v19  ;;  %1014 = vset.pattern.permute.xlu0 %v1149_v19 }
  0xe9   : > { %730 = vperm.xlu1 %1013, %v1274_v2  }
  0xea   : > { %v463_v40 = vpop.permute.xlu1 %462  ;;  %v458_v60 = vmul.f32 %v1338_v48, %v452_v46  ;;  %v459_v61 = vmul.f32 %v1338_v48, %v453_v47 }
  0xec   : > { %v461_v9 = vadd.f32 %v459_v61, %v431_v1  ;;  %v460_v10 = vadd.f32 %v458_v60, %v430_v0 }
  0xee   : > { %v465_v54 = vpop.permute.xlu1 %464 }
  0xef   : > { %v467_v58 = vsel %vm466_vm6, %v463_v40, %v465_v54  ;;  %v468_v59 = vsel %vm466_vm6, %v465_v54, %v463_v40 }
  0xf0   : > { %v482_v62 = vmul.f32 %v475_v20, %v467_v58  ;;  %v483_v63 = vmul.f32 %v479_v49, %v468_v59 }
  0xf2   : > { %v488_v33 = vmul.f32 %v486_v8, %v482_v62  ;;  %v489_v3 = vmul.f32 %v486_v8, %v483_v63  ;;  %v495_v34 = vpop.permute.xlu1 %494  ;;  %v522_v8 = vld [vmem:[%s1486_s3] sm:$0xff] }
  0xf3   : > { %v497_v4 = vsel %vm496_vm7, %v493_v35, %v495_v34  ;;  %v498_v5 = vsel %vm496_vm7, %v495_v34, %v493_v35 }
  0xf4   : > { %v512_v6 = vmul.f32 %v505_v55, %v497_v4  ;;  %v513_v7 = vmul.f32 %v509_v30, %v498_v5  ;;  %v491_v11 = vadd.f32 %v489_v3, %v461_v9  ;;  %v490_v12 = vadd.f32 %v488_v33, %v460_v10 }
  0xf6   : > { %v519_v48 = vmul.f32 %v516_v41, %v513_v7  ;;  %v518_v14 = vmul.f32 %v516_v41, %v512_v6  ;;  %v534_v25 = vpop.permute.xlu1 %533 }
  0xf8   : > { %v1385_v15 = vadd.f32 %v519_v48, %v491_v11  ;;  %v1387_v18 = vadd.f32 %v518_v14, %v490_v12 }
  0xfa   : > { %543 = vmatprep.subr.mxu0 %v1385_v15 }
  0xfb   : > { %544 = vmatpush1.msra.mxu0 %v1387_v18 }
  0xfc   : > { %907 = vmatmul.mubr.msk.f32.vlgmr.msra.gmra.mrb[0].mxu0 %vm536_vm8, %v522_v8 }
  0xfd   : > { %613 = vmatprep.mubr.f32.mxu0 %v1148_v13 }
 0x100   : > { %908 = vmatmul.mubr.msk.f32.gmra.mrb[2].mxu0 %vm536_vm8, %v523_v31 }
 0x1cf   : > { %v609_v22 = vpop.f32.mrb[0].mxu0 }
 0x1d0   : > { %v1399_v16 = vadd.f32 %v609_v22, %v529_v21  ;;  %v611_v23 = vpop.f32.mrb[1].mxu0 }
 0x1d1   : > { %v1401_v24 = vadd.f32 %v611_v23, %v529_v21 }
 0x1d2   : > { %v1404_v13 = vmul.f32 0.70710677, %v1399_v16 }
 0x1d3   : > { %v1407_v26 = vmul.f32 0.70710677, %v1401_v24  ;;  %v615_v27 = vpop.f32.mrb[2].mxu0 }
 0x1d4   : > { %v628_v17 = vand.u32 2147483647, %v1404_v13  ;;  %v1410_v28 = vadd.f32 %v615_v27, %v534_v25  ;;  %v617_v2 = vpop.f32.mrb[3].mxu0  ;;  %vm708_vm9 = vcmp.lt.f32.partialorder %v1404_v13, 0.0 }
 0x1d5   : > { %v629_v29 = vand.u32 2147483647, %v1407_v26  ;;  %v1413_v32 = vadd.f32 %v617_v2, %v534_v25  ;;  %vm709_vm10 = vcmp.lt.f32.partialorder %v1407_v26, 0.0 }
 0x1d6   : > { %v632_v36 = vmul.f32 0.3275911, %v628_v17  ;;  %v1416_v38 = vmul.f32 0.70710677, %v1410_v28  ;;  %v684_v20 = vsub.f32 0.0, %v628_v17  ;;  %v622_v13 = vmul.f32 0.5, %v1410_v28 }
 0x1d7   : > { %v633_v39 = vmul.f32 0.3275911, %v629_v29  ;;  %v1419_v40 = vmul.f32 0.70710677, %v1413_v32  ;;  %v685_v49 = vsub.f32 0.0, %v629_v29 }
 0x1d8   : > { %v636_v41 = vadd.f32 1.0, %v632_v36  ;;  %v630_v37 = vand.u32 2147483647, %v1416_v38  ;;  %v688_v51 = vmul.f32 %v684_v20, %v628_v17  ;;  %vm710_vm11 = vcmp.lt.f32.partialorder %v1416_v38, 0.0 }
 0x1d9   : > { %v637_v42 = vadd.f32 1.0, %v633_v39  ;;  %v631_v43 = vand.u32 2147483647, %v1419_v40  ;;  %v689_v54 = vmul.f32 %v685_v49, %v629_v29  ;;  %vm711_vm12 = vcmp.lt.f32.partialorder %v1419_v40, 0.0 }
 0x1da   : > { %1015 = vrcp.f32 %v636_v41  ;;  %v634_v44 = vmul.f32 0.3275911, %v630_v37  ;;  %v686_v52 = vsub.f32 0.0, %v630_v37  ;;  %v692_v59 = vmul.f32 1.442695, %v688_v51 }
 0x1db   : > { %1017 = vrcp.f32 %v637_v42  ;;  %v635_v45 = vmul.f32 0.3275911, %v631_v43  ;;  %v687_v55 = vsub.f32 0.0, %v631_v43  ;;  %v694_v63 = vmul.f32 1.442695, %v689_v54 }
 0x1dc   : > { %v638_v46 = vadd.f32 1.0, %v634_v44  ;;  %v690_v60 = vmul.f32 %v686_v52, %v630_v37 }
 0x1dd   : > { %v639_v47 = vadd.f32 1.0, %v635_v45  ;;  %v691_v35 = vmul.f32 %v687_v55, %v631_v43 }
 0x1de   : > { %1019 = vrcp.f32 %v638_v46  ;;  %v696_v5 = vmul.f32 1.442695, %v690_v60 }
 0x1df   : > { %1021 = vrcp.f32 %v639_v47  ;;  %v698_v9 = vmul.f32 1.442695, %v691_v35 }
 0x1e0   : > { %1023 = vpow2.f32 %v692_v59 }
 0x1e1   : > { %1025 = vpow2.f32 %v694_v63 }
 0x1e2   : > { %1027 = vpow2.f32 %v696_v5 }
 0x1e3   : > { %1029 = vpow2.f32 %v698_v9 }
 0x1e4   : > { %v1016_v50 = vpop.eup %1015 }
 0x1e5   : > { %v1018_v53 = vpop.eup %1017  ;;  %v648_v30 = vmul.f32 1.0614054, %v1016_v50 }
 0x1e6   : > { %v649_v56 = vmul.f32 1.0614054, %v1018_v53 }
 0x1e7   : > { %v909_v57 = vadd.f32 -1.4531521, %v648_v30 }
 0x1e8   : > { %v1020_v58 = vpop.eup %1019  ;;  %v910_v61 = vadd.f32 -1.4531521, %v649_v56 }
 0x1e9   : > { %v1022_v62 = vpop.eup %1021  ;;  %v650_v0 = vmul.f32 1.0614054, %v1020_v58  ;;  %v656_v1 = vmul.f32 %v1016_v50, %v909_v57 }
 0x1ea   : > { %v651_v33 = vmul.f32 1.0614054, %v1022_v62  ;;  %v657_v3 = vmul.f32 %v1018_v53, %v910_v61  ;;  %v1024_v41 = vpop.eup %1023 }
 0x1eb   : > { %v911_v34 = vadd.f32 -1.4531521, %v650_v0  ;;  %v660_v4 = vadd.f32 1.4214138, %v656_v1  ;;  %v1026_v43 = vpop.eup %1025  ;;  %v620_v1 = vmul.f32 0.5, %v1399_v16  ;;  %v728_v16 = vld [vmem:[%s1488_s5] sm:$0xff] }
 0x1ec   : > { %v912_v6 = vadd.f32 -1.4531521, %v651_v33  ;;  %v661_v7 = vadd.f32 1.4214138, %v657_v3  ;;  %v1028_v51 = vpop.eup %1027  ;;  %v621_v3 = vmul.f32 0.5, %v1401_v24  ;;  %v731_v24 = vpop.permute.xlu1 %730 }
 0x1ed   : > { %v658_v10 = vmul.f32 %v1020_v58, %v911_v34  ;;  %v664_v11 = vmul.f32 %v1016_v50, %v660_v4  ;;  %v1030_v55 = vpop.eup %1029  ;;  %v623_v34 = vmul.f32 0.5, %v1413_v32 }
 0x1ee   : > { %v659_v48 = vmul.f32 %v1022_v62, %v912_v6  ;;  %v665_v12 = vmul.f32 %v1018_v53, %v661_v7 }
 0x1ef   : > { %v662_v14 = vadd.f32 1.4214138, %v658_v10  ;;  %v913_v8 = vadd.f32 -0.28449672, %v664_v11 }
 0x1f0   : > { %v663_v31 = vadd.f32 1.4214138, %v659_v48  ;;  %v914_v19 = vadd.f32 -0.28449672, %v665_v12 }
 0x1f1   : > { %v666_v21 = vmul.f32 %v1020_v58, %v662_v14  ;;  %v672_v22 = vmul.f32 %v1016_v50, %v913_v8 }
 0x1f2   : > { %v667_v23 = vmul.f32 %v1022_v62, %v663_v31  ;;  %v673_v25 = vmul.f32 %v1018_v53, %v914_v19 }
 0x1f3   : > { %v915_v27 = vadd.f32 -0.28449672, %v666_v21  ;;  %v676_v17 = vadd.f32 0.2548296, %v672_v22 }
 0x1f4   : > { %v916_v2 = vadd.f32 -0.28449672, %v667_v23  ;;  %v677_v29 = vadd.f32 0.2548296, %v673_v25 }
 0x1f5   : > { %v674_v36 = vmul.f32 %v1020_v58, %v915_v27  ;;  %v680_v39 = vmul.f32 %v1016_v50, %v676_v17 }
 0x1f6   : > { %v675_v37 = vmul.f32 %v1022_v62, %v916_v2  ;;  %v681_v42 = vmul.f32 %v1018_v53, %v677_v29 }
 0x1f7   : > { %v678_v44 = vadd.f32 0.2548296, %v674_v36  ;;  %v700_v45 = vmul.f32 %v1024_v41, %v680_v39 }
 0x1f8   : > { %v679_v46 = vadd.f32 0.2548296, %v675_v37  ;;  %v701_v47 = vmul.f32 %v1026_v43, %v681_v42 }
 0x1f9   : > { %v682_v20 = vmul.f32 %v1020_v58, %v678_v44  ;;  %v704_v49 = vsub.f32 1.0, %v700_v45 }
 0x1fa   : > { %v683_v52 = vmul.f32 %v1022_v62, %v679_v46  ;;  %v705_v54 = vsub.f32 1.0, %v701_v47 }
 0x1fb   : > { %v702_v30 = vmul.f32 %v1028_v51, %v682_v20  ;;  %v712_v56 = vsub.f32 0.0, %v704_v49 }
 0x1fc   : > { %v703_v57 = vmul.f32 %v1030_v55, %v683_v52  ;;  %v713_v50 = vsub.f32 0.0, %v705_v54 }
 0x1fd   : > { %v706_v53 = vsub.f32 1.0, %v702_v30  ;;  %v716_v59 = vsel %vm708_vm9, %v712_v56, %v704_v49 }
 0x1fe   : > { %v707_v60 = vsub.f32 1.0, %v703_v57  ;;  %v717_v61 = vsel %vm709_vm10, %v713_v50, %v705_v54  ;;  %v720_v35 = vadd.f32 1.0, %v716_v59 }
 0x1ff   : > { %v714_v63 = vsub.f32 0.0, %v706_v53  ;;  %v721_v62 = vadd.f32 1.0, %v717_v61 }
 0x200   : > { %v715_v58 = vsub.f32 0.0, %v707_v60  ;;  %v724_v5 = vmul.f32 %v720_v35, %v620_v1 }
 0x201   : > { %v718_v0 = vsel %vm710_vm11, %v714_v63, %v706_v53  ;;  %v725_v6 = vmul.f32 %v721_v62, %v621_v3 }
 0x202   : > { %v719_v33 = vsel %vm711_vm12, %v715_v58, %v707_v60  ;;  %v722_v26 = vadd.f32 1.0, %v718_v0 }
 0x203   : > { %v723_v4 = vadd.f32 1.0, %v719_v33 }
 0x204   : > { %v726_v38 = vmul.f32 %v722_v26, %v622_v13 }
 0x205   : > { %v727_v7 = vmul.f32 %v723_v4, %v623_v34 }
 0x206   : > { %v927_v40 = vpack.c.bf16 %v726_v38, %v724_v5 }
 0x207   : > { %v925_v9 = vpack.c.bf16 %v727_v7, %v725_v6 }
 0x209   : > { %926 = vmatprep.subr.bf16.mxu1 %v925_v9 }
 0x20a   : > { %928 = vmatpush1.bf16.msra.mxu1 %v927_v40 }
 0x20d   : > { %917 = vmatmul.mubr.msk.f32.vlgmr.msra.gmra.mrb[0].mxu1 %vm733_vm13, %v728_v16 }
 0x2e0   : > { %v803_v28 = vpop.f32.mrb[0].mxu1 }
 0x2e1   : > { %v804_v32 = vadd.f32 %v803_v28, %v731_v24  ;;  %v805_v10 = vpop.f32.mrb[1].mxu1 }
 0x2e2   : > { %v806_v11 = vadd.f32 %v805_v10, %v731_v24 }
 0x2e3   : > { %v808_v48 = vadd.f32 %v804_v32, %v1387_v18 }
 0x2e4   : > { %v809_v12 = vadd.f32 %v806_v11, %v1385_v15 }
 0x2e5   : > { %810 = vst [vmem:[%s259_s29] sm:$0xff] %v808_v48 }
 0x2e6   : > { %811 = vst [vmem:[%s259_s29 + $0x8] sm:$0xff] %v809_v12 }
 0x2e7   : > { %1072 = shalt.err (!%p1069_p7)
}
 0x2e8   : > { %s1073_s17 = scalar_lea.hbm %s1441_s14, 256  ;;  %s1077_s20 = scalar_lea.hbm %s1489_s6, 512 }
 0x2e9   : > { %p1074_p8 = scmp.ne.s32.totalorder %s1441_s14, %s1073_s17  ;;  %p1078_p1 = scmp.lt.u32.totalorder %s1441_s14, %s1489_s6 }
 0x2ea   : > { %p1079_p0 = scmp.lt.u32.totalorder %s1077_s20, %s1073_s17  ;;  %p1081_p6 = scmp.lt.u32.totalorder %s1073_s17, %s1441_s14 }
 0x2eb   : > { %p1075_p11 = pnand %p1074_p8, %p1500_p9 }
 0x2ec   : > { %p1080_p5 = por %p1079_p0, %p1078_p1 }
 0x2ed   : > { %p1076_p13 = pneg %p1075_p11 }
 0x2ee   : > { %p1082_p10 = por %p1081_p6, %p1080_p5 }
 0x2f0   : > { %p1083_p12 = pnand %p1082_p10, %p1076_p13 }
 0x2f2   : > { %1086 = shalt.err (!%p1083_p12)
}
 0x2f3   : > { %933 = dma.vmem_to_hbm [thread:$0]  (%p1500_p9), %s1443_s10, 256, %s1441_s14, %s813_s25  }
 0x2f4 PF: > { %p945_p2 = scmp.ge.s32.totalorder %s1125_s24, 2  ;;  %s839_s29 = sand.u32 1, %s1113_s21  }
 0x2f5   : > { %p1501_p3 = scmp.ne.s32.totalorder %s1494_s8, 0  ;;  %s840_s12 = scalar_lea.sflag [#allocation4], %s839_s29 }
 0x2f7   : > { %p940_p4 = pnand %p945_p2, %p1501_p3 }
 0x2f9   : > { %1108 = dma.done.wait (!%p940_p4), %s840_s12, 256  }
 0x2fa   : > { %1110 = vsyncadd (!%p940_p4), %s840_s12, 4294967040  ;;  %p17_p7 = scmp.ge.s32.totalorder %s1211_s27, 4   ;;  %s1502_s21 = smov %s1117_s22 }
 0x2fb   : > { %s1503_s22 = smov %s1121_s23  ;;  %s1504_s23 = smov %s1222_s30 }
 0x2fc   : > { %s1505_s24 = smov %s1211_s27  ;;  %19 = sbr.rel (!%p17_p7) target bundleno = 4 (0x4), region = 91 }
 0x303   :  { %845 = vsyncpa [#allocation3], 1 }
 0x304   :  { %847 = vsyncpa [#allocation3 + $0x1], 1 }
 0x305   :  { %848 = vsyncpa [#allocation4], 1 }
 0x306   :  { %850 = vsyncpa [#allocation4 + $0x1], 1 }

</bundles_post_ra>
